<compile_context>
chip_gen: v7x
topology: tpu7x:2x2x1
jax: 0.10.0
libtpu: 0.0.40
codegen_flags: <defaults>
</compile_context>

<pallas_src>
import jax
import jax.numpy as jnp
from jax.experimental import pallas as pl
from jax.experimental.pallas import tpu as pltpu

_LANES = 128                      # lane width of the flattened-input slab
_VMEM_BUDGET = 16 * 1024 * 1024   # budget for double-buffered tiles + temporaries
_MAX_ROWS = 2048                  # hard cap on rows per grid step
_VMEM_LIMIT = 32 * 1024 * 1024    # explicit scoped-VMEM limit (safe on v5e/v6e/v7x)


def _cdiv(a, b):
    return -(-a // b)


def _make_kernel(out_dim):
    def kernel(a_ref, bb_ref, e_ref, x_ref, o_ref):
        # a_ref : SMEM (1,)               f32  A = 0.5 * inv_d / exp(beta)
        # bb_ref: VMEM (1, out_dim*128)   f32  B[j] = 0.5*(p0*inv_d + thr_{j%od})/exp(beta)
        # e_ref : VMEM (128, out_dim*128) f32  gather matrix E[l, j] = (j//od == l)
        # x_ref : VMEM (tr, 128)          native-dtype row tile of flattened input
        # o_ref : VMEM (tr, out_dim*128)  interleaved output tile
        xf = x_ref[...].astype(jnp.float32)
        if out_dim > 1:
            # Lane-expansion gather as a tiny MXU matmul: xg[:, j] = xf[:, j // out_dim].
            # E is 0/1 so HIGHEST precision keeps this exact in f32.
            xg = jnp.dot(xf, e_ref[...],
                         preferred_element_type=jnp.float32,
                         precision=jax.lax.Precision.HIGHEST)
        else:
            xg = xf
        z = xg * a_ref[0] - bb_ref[...]
        # sigmoid(2z) == 0.5*tanh(z) + 0.5  -> single EUP transcendental per output
        o_ref[...] = (0.5 * jnp.tanh(z) + 0.5).astype(o_ref.dtype)
    return kernel


def _row_tile(n_rows, out_dim, in_bytes, out_bytes):
    """Rows per grid step: VMEM-budgeted, sublane-aligned, >= ~4 grid steps."""
    packing = max(4 // in_bytes, 4 // out_bytes, 1)
    sub = 8 * packing                       # sublane multiple: 8 f32, 16 bf16, 32 int8
    out_lanes = out_dim * _LANES
    bytes_per_row = (2 * _LANES * in_bytes          # double-buffered input tile
                     + 2 * out_lanes * out_bytes    # double-buffered output tile
                     + 3 * out_lanes * 4)           # in-kernel f32 temporaries
    cap = _VMEM_BUDGET // bytes_per_row
    cap = max(sub, min(_MAX_ROWS, (cap // sub) * sub))
    # aim for >= 4 grid steps (pipelining + v7x megacore) but keep steps >= ~512 rows
    want = ((_cdiv(n_rows, 4) + sub - 1) // sub) * sub
    tr = max(min(cap, 512), min(cap, want))
    if tr >= n_rows:
        tr = n_rows        # single tile: block == full dim, always layout-legal
    return tr


def inequality_forward(states, thresholds, beta=0.0, distribution=None,
                       dist_params=(0.0, 1.0), out_dtype=None):
    """Pallas equivalent of Inequality.forward (estimate_parameters=False)."""
    # TODO(synk): the estimate_parameters / Normalize.keep_data statistics path is
    # training-time state collection and is not implemented here.
    orig_shape = states.shape
    out_dim = int(thresholds.shape[0])
    out_lanes = out_dim * _LANES
    if out_dtype is None:
        out_dtype = states.dtype
    in_bytes = jnp.dtype(states.dtype).itemsize
    out_bytes = jnp.dtype(out_dtype).itemsize

    # ---- fold Normalize + SoftCmp into one affine:  z/2 = A*x - B_k ----------
    s = jnp.exp(-jnp.asarray(beta, jnp.float32))            # 1 / exp(beta)
    thr = thresholds.astype(jnp.float32)
    if distribution is None:
        p0 = jnp.float32(0.0)
        inv_d = jnp.float32(1.0)
    elif distribution == "normal":
        p0 = jnp.asarray(dist_params[0], jnp.float32)
        inv_d = 1.0 / jnp.asarray(dist_params[1], jnp.float32)
    elif distribution == "uniform":
        p0 = jnp.asarray(dist_params[0], jnp.float32)
        inv_d = 1.0 / (jnp.asarray(dist_params[1], jnp.float32) - p0 + 1e-5)
    else:
        raise NotImplementedError(distribution)
    a = jnp.reshape(0.5 * s * inv_d, (1,))                   # SMEM scalar
    b_k = 0.5 * s * (p0 * inv_d + thr)                       # (out_dim,)
    bb = jnp.tile(b_k, _LANES).reshape(1, out_lanes)         # B[j] = b_{j % out_dim}
    # gather matrix: E[l, j] = 1 iff l == j // out_dim
    e = (jnp.arange(_LANES, dtype=jnp.int32)[:, None]
         == (jnp.arange(out_lanes, dtype=jnp.int32)[None, :] // out_dim)
         ).astype(jnp.float32)

    # ---- lane-dense flattened input slab (native dtype, no wrapper upcast) ---
    x = states.reshape(-1)
    total = x.shape[0]
    pad = (-total) % _LANES
    if pad:          # ragged totals: one input pad copy + one output slice copy
        x = jnp.pad(x, (0, pad))
    n_rows = x.shape[0] // _LANES
    x2 = x.reshape(n_rows, _LANES)

    tr = _row_tile(n_rows, out_dim, in_bytes, out_bytes)
    grid = (_cdiv(n_rows, tr),)

    out2d = pl.pallas_call(
        _make_kernel(out_dim),
        out_shape=jax.ShapeDtypeStruct((n_rows, out_lanes), out_dtype),
        grid_spec=pltpu.PrefetchScalarGridSpec(
            num_scalar_prefetch=0,
            grid=grid,
            in_specs=[
                pl.BlockSpec(memory_space=pltpu.MemorySpace.SMEM),       # a
                pl.BlockSpec((1, out_lanes), lambda i: (0, 0)),          # bb (resident)
                pl.BlockSpec((_LANES, out_lanes), lambda i: (0, 0)),     # E  (resident)
                pl.BlockSpec((tr, _LANES), lambda i: (i, 0)),            # input row tile
            ],
            out_specs=pl.BlockSpec((tr, out_lanes), lambda i: (i, 0)),
        ),
        compiler_params=pltpu.CompilerParams(
            dimension_semantics=("parallel",),
            vmem_limit_bytes=_VMEM_LIMIT,
        ),
    )(a, bb, e, x2)

    # (n_rows, out_dim*128) row-major is already element-major / out_dim-minor:
    #   flat[(128*r + l)*out_dim + k] == out2d[r, out_dim*l + k]
    flat = out2d.reshape(-1)
    if pad:
        flat = flat[: total * out_dim]
    return flat.reshape(orig_shape + (out_dim,))


def _reference(states, thresholds, beta=0.0, distribution=None,
               dist_params=(0.0, 1.0)):
    x = states.astype(jnp.float32)[..., None]
    if distribution == "normal":
        x = (x - dist_params[0]) / dist_params[1]
    elif distribution == "uniform":
        x = (x - dist_params[0]) / (dist_params[1] - dist_params[0] + 1e-5)
    t = thresholds.astype(jnp.float32).reshape((1,) * states.ndim + (-1,))
    return jax.nn.sigmoid((x - t) / jnp.exp(jnp.asarray(beta, jnp.float32)))


if __name__ == "__main__":
    key = jax.random.PRNGKey(0)
    k_thr, k1, k2, k3 = jax.random.split(key, 4)

    # Inequality.__init__(out_dim=3): thresholds ~ normal(0, 1)
    out_dim = 3
    thresholds = jax.random.normal(k_thr, (out_dim,), dtype=jnp.float32)
    beta = 0.3

    # 1) module-typical small shape [batch, length, n_agents, features], f32
    s1 = jax.random.normal(k1, (2, 8, 4, 16), dtype=jnp.float32)
    o1 = jax.block_until_ready(inequality_forward(s1, thresholds, beta=beta))
    r1 = _reference(s1, thresholds, beta=beta)
    assert o1.shape == s1.shape + (out_dim,), (o1.shape, s1.shape)
    assert jnp.allclose(o1, r1, atol=1e-5, rtol=1e-5), "mismatch (small f32)"

    # 2) larger ragged shape + 'normal' normalization -> multi-step pipelined grid
    s2 = jax.random.normal(k2, (4, 50, 37, 40), dtype=jnp.float32) * 2.0 + 0.3
    o2 = jax.block_until_ready(
        inequality_forward(s2, thresholds, beta=beta,
                           distribution="normal", dist_params=(0.3, 1.7)))
    r2 = _reference(s2, thresholds, beta=beta,
                    distribution="normal", dist_params=(0.3, 1.7))
    assert o2.shape == s2.shape + (out_dim,), (o2.shape, s2.shape)
    assert jnp.allclose(o2, r2, atol=1e-5, rtol=1e-5), "mismatch (ragged normal)"

    # 3) bf16 input -> bf16 output (native dtype end to end, no wrapper upcast)
    s3 = jax.random.normal(k3, (2, 8, 4, 16), dtype=jnp.bfloat16)
    o3 = jax.block_until_ready(inequality_forward(s3, thresholds, beta=beta))
    r3 = _reference(s3.astype(jnp.float32), thresholds, beta=beta)
    assert o3.dtype == jnp.bfloat16, o3.dtype
    assert jnp.allclose(o3.astype(jnp.float32), r3, atol=2e-2, rtol=2e-2), \
        "mismatch (bf16)"

    # 4) out_dim=1 (module default) -> no gather matmul path
    thr1 = jax.random.normal(k_thr, (1,), dtype=jnp.float32)
    o4 = jax.block_until_ready(inequality_forward(s1, thr1, beta=0.0))
    r4 = _reference(s1, thr1, beta=0.0)
    assert o4.shape == s1.shape + (1,), o4.shape
    assert jnp.allclose(o4, r4, atol=1e-5, rtol=1e-5), "mismatch (out_dim=1)"

    print("KERNEL_OK")
</pallas_src>

<mosaic_0001>
module attributes {stable_mosaic.version = 11 : i64} {
  func.func @kernel(%arg0: i32, %arg1: memref<1xf32, #tpu.memory_space<smem>>, %arg2: memref<1x384xf32, #tpu.memory_space<vmem>>, %arg3: memref<128x384xf32, #tpu.memory_space<vmem>>, %arg4: memref<8x128xf32, #tpu.memory_space<vmem>>, %arg5: memref<8x384xf32, #tpu.memory_space<vmem>>) attributes {dimension_semantics = [#tpu.dimension_semantics<parallel>], iteration_bounds = array<i64: 1>, scalar_prefetch = 0 : i64, scratch_operands = 0 : i64, tpu.core_type = #tpu.core_type<tc>, window_params = [{transform_indices = @transform_0, window_bounds = array<i64: 1>}, {pipeline_mode = #tpu.pipeline_mode<synchronous>, transform_indices = @transform_1, window_bounds = array<i64: 1, 384>}, {pipeline_mode = #tpu.pipeline_mode<synchronous>, transform_indices = @transform_2, window_bounds = array<i64: 128, 384>}, {transform_indices = @transform_3, window_bounds = array<i64: 8, 128>}, {transform_indices = @transform_4, window_bounds = array<i64: 8, 384>}]} {
    %c0 = arith.constant 0 : index
    %c0_0 = arith.constant 0 : index
    %0 = vector.load %arg4[%c0, %c0_0] : memref<8x128xf32, #tpu.memory_space<vmem>>, vector<8x128xf32>
    %c0_1 = arith.constant 0 : index
    %c0_2 = arith.constant 0 : index
    %1 = vector.load %arg3[%c0_1, %c0_2] : memref<128x384xf32, #tpu.memory_space<vmem>>, vector<128x384xf32>
    %cst = arith.constant dense<0.000000e+00> : vector<8x384xf32>
    %2 = tpu.matmul %0, %1, %cst {dimension_numbers = #tpu.dot_dimension_numbers<[1], [0], [0], [1], [0, 0, 1, 1], [], []>, precision = #tpu.contract_precision<fp32>} : vector<8x128xf32>, vector<128x384xf32>, vector<8x384xf32> -> vector<8x384xf32>
    %c0_3 = arith.constant 0 : index
    %3 = memref.load %arg1[%c0_3] : memref<1xf32, #tpu.memory_space<smem>>
    %4 = vector.broadcast %3 : f32 to vector<8x384xf32>
    %5 = arith.mulf %2, %4 : vector<8x384xf32>
    %c0_4 = arith.constant 0 : index
    %c0_5 = arith.constant 0 : index
    %6 = vector.load %arg2[%c0_4, %c0_5] : memref<1x384xf32, #tpu.memory_space<vmem>>, vector<1x384xf32>
    %7 = vector.broadcast %6 : vector<1x384xf32> to vector<8x384xf32>
    %8 = arith.subf %5, %7 : vector<8x384xf32>
    %9 = math.tanh %8 : vector<8x384xf32>
    %cst_6 = arith.constant 5.000000e-01 : f32
    %10 = vector.broadcast %cst_6 : f32 to vector<8x384xf32>
    %11 = arith.mulf %10, %9 : vector<8x384xf32>
    %cst_7 = arith.constant 5.000000e-01 : f32
    %12 = vector.broadcast %cst_7 : f32 to vector<8x384xf32>
    %13 = arith.addf %11, %12 : vector<8x384xf32>
    %c0_8 = arith.constant 0 : index
    %c0_9 = arith.constant 0 : index
    %14 = vector.load %arg5[%c0_8, %c0_9] : memref<8x384xf32, #tpu.memory_space<vmem>>, vector<8x384xf32>
    tpu.vector_store %arg5[%c0_8, %c0_9], %13 {strides = array<i32>} : memref<8x384xf32, #tpu.memory_space<vmem>>, vector<8x384xf32>,
    return
  }
  func.func @transform_0(%arg0: i32) -> i32 {
    %c0_i32 = arith.constant 0 : i32
    %c0_i32_0 = arith.constant 0 : i32
    return %c0_i32 : i32
  }
  func.func @transform_1(%arg0: i32) -> (i32, i32) {
    %c0_i32 = arith.constant 0 : i32
    %c0_i32_0 = arith.constant 0 : i32
    %c0_i32_1 = arith.constant 0 : i32
    return %c0_i32, %c0_i32_0 : i32, i32
  }
  func.func @transform_2(%arg0: i32) -> (i32, i32) {
    %c0_i32 = arith.constant 0 : i32
    %c0_i32_0 = arith.constant 0 : i32
    %c0_i32_1 = arith.constant 0 : i32
    return %c0_i32, %c0_i32_0 : i32, i32
  }
  func.func @transform_3(%arg0: i32) -> (i32, i32) {
    %c0_i32 = arith.constant 0 : i32
    %c0_i32_0 = arith.constant 0 : i32
    return %arg0, %c0_i32 : i32, i32
  }
  func.func @transform_4(%arg0: i32) -> (i32, i32) {
    %c0_i32 = arith.constant 0 : i32
    %c0_i32_0 = arith.constant 0 : i32
    return %arg0, %c0_i32 : i32, i32
  }
}

</mosaic_0001>

<bundles_post_ra>
// kernel: tpu_custom_call.1
= control target key start
LH: loop header
LB: loop body
LE: loop exit
PB: predicated region body
PF: predicated region fallthrough
CT: control target
= control target key end

     0   :  { %10 = vsyncpa [#allocation4], 0  ;;  %s3130_s0 = inlined_call_operand.<no memory space> [shape: f32[1], index: 0, kind: input, shape index: {}]   ;;  %s3131_s1 = inlined_call_operand.vmem [shape: f32[1,384], index: 1, kind: input, shape index: {}]   ;;  %s3132_s2 = inlined_call_operand.hbm [shape: f32[128,384], index: 2, kind: input, shape index: {}]   ;;  %s3133_s3 = inlined_call_operand.vmem [shape: f32[8,128], index: 3, kind: input, shape index: {}]   ;;  %s3134_s4 = inlined_call_operand.hbm [shape: f32[8,384], index: 4, kind: output, shape index: {}]  }
   0x1   :  { %11 = vsyncpa [#allocation5], 0  ;;  %s2359_s15 = smov [#allocation3]   ;;  %s2311_s19 = scalar_lea.hbm %s3132_s2, 6144 }
   0x2   :  { %s21_s16 = sshll.u32 %s2359_s15, 4  ;;  %p2312_p0 = scmp.ne.s32.totalorder %s3132_s2, %s2311_s19  ;;  %s22_s16 = int_to_ptr.vmem [resolvable:$true] %s21_s16 }
   0x3   :  { %p2315_p1 = scmp.lt.u32.totalorder %s2311_s19, %s3132_s2 }
   0x5   :  { %p2317_p2 = pnand %p2315_p1, %p2312_p0 }
   0x7   :  { %2320 = shalt.err (!%p2317_p2)
}
   0x8   :  { %s2321_s24 = scalar_lea.vmem %s22_s16, 6144  ;;  %p2326_p4 = scmp.lt.s32.totalorder %s22_s16, %s22_s16 }
   0x9   :  { %p2322_p3 = scmp.ne.s32.totalorder %s22_s16, %s2321_s24  ;;  %p2327_p5 = scmp.lt.s32.totalorder %s2321_s24, %s2321_s24 }
   0xb   :  { %p2328_p6 = por %p2327_p5, %p2326_p4 }
   0xd   :  { %p2329_p7 = pnand %p2328_p6, %p2322_p3 }
   0xf   :  { %2332 = shalt.err (!%p2329_p7)
}
  0x10   :  { %s2360_s25 = smov 384   ;;  %s2361_s26 = smov 24  }
  0x11   :  { %27 = dma.hbm_to_vmem [thread:$0]  %s3132_s2, 6144, %s22_s16, [#allocation4], %s2360_s25, %s2360_s25, %s2361_s26  }
  0x12   :  { %2355 = dma.done.wait [#allocation4], 6144  }
  0x13   :  { %2356 = vsyncadd [#allocation4], 4294961152  ;;  %v3141_v0 = vmov 0.0|0.0   ;;  %vm2363_vm0 = vmmov 0   ;;  %v3135_v1 = vmov 0.0   ;;  %v35_v2 = vld [vmem:[#allocation3 + $0x8] sm:$0xff] }
  0x14   :  { %2134 = vmatprep.subr.bf16.mxu1 %v3141_v0  ;;  %1764 = vmatprep.mubr.msk.f32.mxu1 %vm2363_vm0, %v3135_v1  ;;  %v38_v3 = vld [vmem:[#allocation3 + $0x20] sm:$0xff]  ;;  %v36_v4 = vld [vmem:[#allocation3 + $0x10] sm:$0xff]  ;;  %v82_v5 = vand.u32 4294901760, %v35_v2  ;;  %v39_v7 = vld [vmem:[#allocation3 + $0x28] sm:$0xff] }
  0x15   :  { %178 = vmatprep.mubr.f32.mxu0 %v3135_v1  ;;  %v86_v6 = vand.u32 4294901760, %v38_v3  ;;  %v938_v8 = vand.u32 4294901760, %v36_v4  ;;  %v34_v9 = vld [vmem:[#allocation3] sm:$0xff]  ;;  %v37_v10 = vld [vmem:[#allocation3 + $0x18] sm:$0xff]  ;;  %v941_v11 = vand.u32 4294901760, %v39_v7  ;;  %v44_v15 = vld [vmem:[#allocation3 + $0x50] sm:$0xff] }
  0x16   :  { %v84_v12 = vand.u32 4294901760, %v34_v9  ;;  %v88_v13 = vand.u32 4294901760, %v37_v10  ;;  %v41_v14 = vld [vmem:[#allocation3 + $0x38] sm:$0xff]  ;;  %v42_v16 = vld [vmem:[#allocation3 + $0x40] sm:$0xff]  ;;  %v2409_v18 = vsub.f32 %v35_v2, %v82_v5  ;;  %v40_v22 = vld [vmem:[#allocation3 + $0x30] sm:$0xff]  ;;  %v94_v31 = vand.u32 4294901760, %v44_v15 }
  0x17   :  { %v2407_v17 = vpack.c.bf16 %v86_v6, %v82_v5  ;;  %v2411_v19 = vsub.f32 %v38_v3, %v86_v6  ;;  %v2413_v20 = vsub.f32 %v36_v4, %v938_v8  ;;  %v45_v21 = vld [vmem:[#allocation3 + $0x58] sm:$0xff]  ;;  %v43_v23 = vld [vmem:[#allocation3 + $0x48] sm:$0xff]  ;;  %v2415_v24 = vpack.c.bf16 %v941_v11, %v938_v8  ;;  %v50_v33 = vld [vmem:[#allocation3 + $0x80] sm:$0xff] }
  0x18   :  { %v2417_v25 = vsub.f32 %v39_v7, %v941_v11  ;;  %v2419_v26 = vpack.c.bf16 %v88_v13, %v84_v12  ;;  %v2421_v27 = vsub.f32 %v34_v9, %v84_v12  ;;  %v47_v28 = vld [vmem:[#allocation3 + $0x68] sm:$0xff]  ;;  %v2424_v29 = vsub.f32 %v37_v10, %v88_v13  ;;  %v48_v38 = vld [vmem:[#allocation3 + $0x70] sm:$0xff]  ;;  %v46_v44 = vld [vmem:[#allocation3 + $0x60] sm:$0xff] }
  0x19   :  { %3258 = vst [vmem:[#allocation9_spill] sm:$0xff] %v2407_v17  ;;  %3259 = vst [vmem:[#allocation10_spill] sm:$0xff] %v2413_v20  ;;  %1943 = vmatprep.subr.bf16.mxu0 %v2407_v17  ;;  %v90_v30 = vand.u32 4294901760, %v41_v14  ;;  %v944_v32 = vand.u32 4294901760, %v42_v16  ;;  %2136 = vmatpush3.bf16.msra.mxu1 %v2415_v24  ;;  %v947_v34 = vand.u32 4294901760, %v45_v21  ;;  %v92_v35 = vand.u32 4294901760, %v40_v22 }
  0x1a   :  { %3260 = vst [vmem:[#allocation11_spill] sm:$0xff] %v2415_v24  ;;  %3261 = vst [vmem:[#allocation12_spill] sm:$0xff] %v2417_v25  ;;  %1945 = vmatpush1.bf16.msra.mxu0 %v2419_v26  ;;  %v96_v36 = vand.u32 4294901760, %v43_v23  ;;  %v98_v37 = vand.u32 4294901760, %v47_v28  ;;  %v51_v39 = vld [vmem:[#allocation3 + $0x88] sm:$0xff]  ;;  %2137 = vmatprep.subr.bf16.mxu1 %v3141_v0  ;;  %v2433_v42 = vsub.f32 %v44_v15, %v94_v31  ;;  %v49_v45 = vld [vmem:[#allocation3 + $0x78] sm:$0xff] }
  0x1b   :  { %3262 = vst [vmem:[#allocation13_spill] sm:$0xff] %v2419_v26  ;;  %3263 = vst [vmem:[#allocation14_spill] sm:$0xff] %v2421_v27  ;;  %v2429_v40 = vpack.c.bf16 %v94_v31, %v90_v30  ;;  %v2431_v41 = vsub.f32 %v41_v14, %v90_v30  ;;  %v2435_v43 = vsub.f32 %v42_v16, %v944_v32  ;;  %v53_v46 = vld [vmem:[#allocation3 + $0x98] sm:$0xff]  ;;  %v56_v51 = vld [vmem:[#allocation3 + $0xb0] sm:$0xff]  ;;  %v102_v53 = vand.u32 4294901760, %v50_v33 }
  0x1c   :  { %3264 = vst [vmem:[#allocation15_spill] sm:$0xff] %v2424_v29  ;;  %v2437_v47 = vpack.c.bf16 %v947_v34, %v944_v32  ;;  %v2439_v48 = vsub.f32 %v45_v21, %v947_v34  ;;  %v2441_v49 = vpack.c.bf16 %v96_v36, %v92_v35  ;;  %v2443_v50 = vsub.f32 %v40_v22, %v92_v35  ;;  %v54_v60 = vld [vmem:[#allocation3 + $0xa0] sm:$0xff]  ;;  %v57_v61 = vld [vmem:[#allocation3 + $0xb8] sm:$0xff]  ;;  %v52_v4 = vld [vmem:[#allocation3 + $0x90] sm:$0xff] }
  0x1d   :  { %3265 = vst [vmem:[#allocation16_spill] sm:$0xff] %v2429_v40  ;;  %3266 = vst [vmem:[#allocation17_spill] sm:$0xff] %v2431_v41  ;;  %1947 = vmatprep.subr.bf16.mxu0 %v2429_v40  ;;  %v2446_v52 = vsub.f32 %v43_v23, %v96_v36  ;;  %v2448_v54 = vsub.f32 %v47_v28, %v98_v37  ;;  %v950_v55 = vand.u32 4294901760, %v48_v38  ;;  %v953_v56 = vand.u32 4294901760, %v51_v39  ;;  %v55_v5 = vld [vmem:[#allocation3 + $0xa8] sm:$0xff]  ;;  %v62_v11 = vld [vmem:[#allocation3 + $0xe0] sm:$0xff] }
  0x1e   :  { %3267 = vst [vmem:[#allocation18_spill] sm:$0xff] %v2437_v47  ;;  %3268 = vst [vmem:[#allocation19_spill] sm:$0xff] %v2441_v49  ;;  %2139 = vmatpush3.bf16.msra.mxu1 %v2437_v47  ;;  %1949 = vmatpush1.bf16.msra.mxu0 %v2441_v49  ;;  %v100_v57 = vand.u32 4294901760, %v46_v44  ;;  %v104_v58 = vand.u32 4294901760, %v49_v45  ;;  %v106_v59 = vand.u32 4294901760, %v53_v46  ;;  %v2453_v62 = vpack.c.bf16 %v102_v53, %v98_v37  ;;  %v59_v6 = vld [vmem:[#allocation3 + $0xc8] sm:$0xff] }
  0x1f   :  { %2140 = vmatprep.subr.bf16.mxu1 %v3141_v0  ;;  %v2455_v63 = vsub.f32 %v50_v33, %v102_v53  ;;  %v2457_v2 = vsub.f32 %v48_v38, %v950_v55  ;;  %v110_v3 = vand.u32 4294901760, %v56_v51  ;;  %v2459_v7 = vpack.c.bf16 %v953_v56, %v950_v55  ;;  %v60_v12 = vld [vmem:[#allocation3 + $0xd0] sm:$0xff]  ;;  %v63_v13 = vld [vmem:[#allocation3 + $0xe8] sm:$0xff]  ;;  %v58_v35 = vld [vmem:[#allocation3 + $0xc0] sm:$0xff] }
  0x20   :  { %3269 = vst [vmem:[#allocation20_spill] sm:$0xff] %v2453_v62  ;;  %v2461_v8 = vsub.f32 %v51_v39, %v953_v56  ;;  %v2463_v9 = vpack.c.bf16 %v104_v58, %v100_v57  ;;  %v2465_v10 = vsub.f32 %v46_v44, %v100_v57  ;;  %1951 = vmatprep.subr.bf16.mxu0 %v2453_v62  ;;  %v956_v22 = vand.u32 4294901760, %v54_v60  ;;  %v61_v44 = vld [vmem:[#allocation3 + $0xd8] sm:$0xff]  ;;  %v66_v57 = vld [vmem:[#allocation3 + $0x100] sm:$0xff]  ;;  %v71_v1 = vld [vmem:[#allocation3 + $0x128] sm:$0xff] }
  0x21   :  { %3270 = vst [vmem:[#allocation21_spill] sm:$0xff] %v2459_v7  ;;  %v2468_v14 = vsub.f32 %v49_v45, %v104_v58  ;;  %v2470_v15 = vpack.c.bf16 %v110_v3, %v106_v59  ;;  %v2472_v16 = vsub.f32 %v53_v46, %v106_v59  ;;  %v2474_v21 = vsub.f32 %v56_v51, %v110_v3  ;;  %v65_v45 = vld [vmem:[#allocation3 + $0xf8] sm:$0xff]  ;;  %v68_v46 = vld [vmem:[#allocation3 + $0x110] sm:$0xff] }
  0x22   :  { %3271 = vst [vmem:[#allocation22_spill] sm:$0xff] %v2463_v9  ;;  %2142 = vmatpush3.bf16.msra.mxu1 %v2459_v7  ;;  %1953 = vmatpush1.bf16.msra.mxu0 %v2463_v9  ;;  %v959_v23 = vand.u32 4294901760, %v57_v61  ;;  %v108_v28 = vand.u32 4294901760, %v52_v4  ;;  %v112_v30 = vand.u32 4294901760, %v55_v5  ;;  %v114_v31 = vand.u32 4294901760, %v59_v6  ;;  %v69_v58 = vld [vmem:[#allocation3 + $0x118] sm:$0xff] }
  0x23   :  { %3272 = vst [vmem:[#allocation23_spill] sm:$0xff] %v2470_v15  ;;  %2143 = vmatprep.subr.bf16.mxu1 %v3141_v0  ;;  %1955 = vmatprep.subr.bf16.mxu0 %v2470_v15  ;;  %v118_v32 = vand.u32 4294901760, %v62_v11  ;;  %v962_v33 = vand.u32 4294901760, %v60_v12  ;;  %v965_v34 = vand.u32 4294901760, %v63_v13  ;;  %v2482_v37 = vsub.f32 %v54_v60, %v956_v22  ;;  %v64_v59 = vld [vmem:[#allocation3 + $0xf0] sm:$0xff]  ;;  %v73_v15 = vld [vmem:[#allocation3 + $0x138] sm:$0xff] }
  0x24   :  { %v2480_v36 = vpack.c.bf16 %v959_v23, %v956_v22  ;;  %v2484_v38 = vsub.f32 %v57_v61, %v959_v23  ;;  %v2486_v39 = vpack.c.bf16 %v112_v30, %v108_v28  ;;  %v2488_v51 = vsub.f32 %v52_v4, %v108_v28  ;;  %v67_v28 = vld [vmem:[#allocation3 + $0x108] sm:$0xff]  ;;  %v77_v47 = vld [vmem:[#allocation3 + $0x158] sm:$0xff]  ;;  %v76_v26 = vld [vmem:[#allocation3 + $0x150] sm:$0xff] }
  0x25   :  { %v2490_v53 = vsub.f32 %v55_v5, %v112_v30  ;;  %v2492_v55 = vpack.c.bf16 %v118_v32, %v114_v31  ;;  %v2494_v56 = vsub.f32 %v59_v6, %v114_v31  ;;  %v2498_v60 = vsub.f32 %v62_v11, %v118_v32  ;;  %v81_v40 = vld [vmem:[#allocation3 + $0x178] sm:$0xff] }
  0x26   :  { %3273 = vst [vmem:[#allocation24_spill] sm:$0xff] %v2480_v36  ;;  %3274 = vst [vmem:[#allocation25_spill] sm:$0xff] %v2486_v39  ;;  %2145 = vmatpush3.bf16.msra.mxu1 %v2480_v36  ;;  %1957 = vmatpush1.bf16.msra.mxu0 %v2486_v39  ;;  %v2500_v61 = vpack.c.bf16 %v965_v34, %v962_v33  ;;  %v2502_v3 = vsub.f32 %v60_v12, %v962_v33  ;;  %v116_v4 = vand.u32 4294901760, %v58_v35  ;;  %v74_v39 = vld [vmem:[#allocation3 + $0x140] sm:$0xff]  ;;  %v72_v12 = vld [vmem:[#allocation3 + $0x130] sm:$0xff] }
  0x27   :  { %3275 = vst [vmem:[#allocation26_spill] sm:$0xff] %v2492_v55  ;;  %2146 = vmatprep.subr.bf16.mxu1 %v3141_v0  ;;  %1959 = vmatprep.subr.bf16.mxu0 %v2492_v55  ;;  %v2506_v5 = vsub.f32 %v63_v13, %v965_v34  ;;  %v120_v6 = vand.u32 4294901760, %v61_v44  ;;  %v122_v22 = vand.u32 4294901760, %v65_v45  ;;  %v126_v23 = vand.u32 4294901760, %v68_v46  ;;  %v75_v34 = vld [vmem:[#allocation3 + $0x148] sm:$0xff]  ;;  %v70_v55 = vld [vmem:[#allocation3 + $0x120] sm:$0xff] }
  0x28   :  { %3276 = vst [vmem:[#allocation27_spill] sm:$0xff] %v2500_v61  ;;  %v2508_v30 = vsub.f32 %v58_v35, %v116_v4  ;;  %v968_v31 = vand.u32 4294901760, %v66_v57  ;;  %v971_v11 = vand.u32 4294901760, %v69_v58  ;;  %v124_v32 = vand.u32 4294901760, %v64_v59 }
  0x29   :  { %v2510_v33 = vpack.c.bf16 %v120_v6, %v116_v4  ;;  %v2512_v36 = vsub.f32 %v61_v44, %v120_v6  ;;  %v2514_v0 = vpack.c.bf16 %v126_v23, %v122_v22  ;;  %v2516_v13 = vsub.f32 %v65_v45, %v122_v22 }
  0x2a   :  { %2148 = vmatpush3.bf16.msra.mxu1 %v2500_v61  ;;  %v2519_v35 = vsub.f32 %v68_v46, %v126_v23  ;;  %v2521_v9 = vpack.c.bf16 %v971_v11, %v968_v31  ;;  %v2523_v7 = vsub.f32 %v66_v57, %v968_v31  ;;  %v2525_v62 = vsub.f32 %v69_v58, %v971_v11  ;;  %v80_v57 = vld [vmem:[#allocation3 + $0x170] sm:$0xff] }
  0x2b   :  { %3277 = vst [vmem:[#allocation28_spill] sm:$0xff] %v2510_v33  ;;  %3278 = vst [vmem:[#allocation29_spill] sm:$0xff] %v2514_v0  ;;  %1961 = vmatpush1.bf16.msra.mxu0 %v2510_v33  ;;  %v3280_v44 = vmov 0.0|0.0   ;;  %v128_v4 = vand.u32 4294901760, %v67_v28  ;;  %v2529_v45 = vsub.f32 %v64_v59, %v124_v32  ;;  %v130_v6 = vand.u32 4294901760, %v71_v1  ;;  %v78_v59 = vld [vmem:[#allocation3 + $0x160] sm:$0xff] }
  0x2c   :  { %3279 = vst [vmem:[#allocation30_spill] sm:$0xff] %v2521_v9  ;;  %2149 = vmatprep.subr.bf16.mxu1 %v3280_v44  ;;  %v134_v22 = vand.u32 4294901760, %v74_v39  ;;  %1963 = vmatprep.subr.bf16.mxu0 %v2514_v0  ;;  %v974_v61 = vand.u32 4294901760, %v72_v12  ;;  %v977_v46 = vand.u32 4294901760, %v75_v34  ;;  %v132_v23 = vand.u32 4294901760, %v70_v55 }
  0x2d   :  { %3281 = vst [vmem:[#allocation31_spill] sm:$0xff] %v2529_v45  ;;  %v136_v49 = vand.u32 4294901760, %v73_v15  ;;  %v2532_v31 = vpack.c.bf16 %v128_v4, %v124_v32  ;;  %v2534_v58 = vsub.f32 %v67_v28, %v128_v4  ;;  %v2538_v33 = vsub.f32 %v71_v1, %v130_v6  ;;  %v79_v32 = vld [vmem:[#allocation3 + $0x168] sm:$0xff] }
  0x2e   :  { %v2536_v11 = vpack.c.bf16 %v134_v22, %v130_v6  ;;  %2151 = vmatpush3.bf16.msra.mxu1 %v2521_v9  ;;  %v2541_v0 = vsub.f32 %v74_v39, %v134_v22  ;;  %v2543_v24 = vpack.c.bf16 %v977_v46, %v974_v61  ;;  %v2545_v17 = vsub.f32 %v72_v12, %v974_v61 }
  0x2f   :  { %3282 = vst [vmem:[#allocation32_spill] sm:$0xff] %v2532_v31  ;;  %v2547_v45 = vsub.f32 %v75_v34, %v977_v46  ;;  %1965 = vmatpush1.bf16.msra.mxu0 %v2532_v31  ;;  %2152 = vmatprep.subr.bf16.mxu1 %v3280_v44  ;;  %v2551_v1 = vpack.c.bf16 %v136_v49, %v132_v23  ;;  %v138_v6 = vand.u32 4294901760, %v77_v47  ;;  %v142_v39 = vand.u32 4294901760, %v80_v57  ;;  %v33_v34 = vld [vmem:[%s3133_s3] sm:$0xff] }
  0x30   :  { %3283 = vst [vmem:[#allocation33_spill] sm:$0xff] %v2536_v11  ;;  %3284 = vst [vmem:[#allocation34_spill] sm:$0xff] %v2543_v24  ;;  %v2553_v28 = vsub.f32 %v70_v55, %v132_v23  ;;  %v2555_v4 = vsub.f32 %v73_v15, %v136_v49  ;;  %1967 = vmatprep.subr.bf16.mxu0 %v2536_v11  ;;  %v980_v22 = vand.u32 4294901760, %v78_v59  ;;  %v983_v61 = vand.u32 4294901760, %v81_v40 }
  0x31   :  { %3285 = vst [vmem:[#allocation35_spill] sm:$0xff] %v2551_v1  ;;  %v140_v12 = vand.u32 4294901760, %v76_v26  ;;  %v2561_v46 = vsub.f32 %v77_v47, %v138_v6  ;;  %v144_v31 = vand.u32 4294901760, %v79_v32  ;;  %v2566_v49 = vpack.c.bf16 %v142_v39, %v138_v6 }
  0x32   :  { %2154 = vmatpush3.bf16.msra.mxu1 %v2543_v24  ;;  %v2568_v15 = vsub.f32 %v80_v57, %v142_v39  ;;  %v2570_v23 = vpack.c.bf16 %v983_v61, %v980_v22  ;;  %v2572_v11 = vsub.f32 %v78_v59, %v980_v22  ;;  %v2576_v47 = vsub.f32 %v81_v40, %v983_v61 }
  0x33   :  { %3286 = vst [vmem:[#allocation36_spill] sm:$0xff] %v2561_v46  ;;  %3287 = vst [vmem:[#allocation37_spill] sm:$0xff] %v2566_v49  ;;  %1969 = vmatpush1.bf16.msra.mxu0 %v2551_v1  ;;  %2155 = vmatprep.subr.bf16.mxu1 %v3280_v44  ;;  %v2578_v46 = vpack.c.bf16 %v144_v31, %v140_v12  ;;  %v2580_v9 = vsub.f32 %v76_v26, %v140_v12  ;;  %v2582_v55 = vand.u32 4294901760, %v33_v34 }
  0x34   :  { %3288 = vst [vmem:[#allocation38_spill] sm:$0xff] %v2568_v15  ;;  %3289 = vst [vmem:[#allocation39_spill] sm:$0xff] %v2570_v23  ;;  %1971 = vmatprep.subr.bf16.mxu0 %v2566_v49  ;;  %v2585_v57 = vsub.f32 %v79_v32, %v144_v31  ;;  %v3296_v6 = vand.u32 4294901760, %v2409_v18  ;;  %v3297_v39 = vand.u32 4294901760, %v2411_v19  ;;  %v3181_v40 = vand.u32 4294901760, %v2413_v20 }
  0x35   :  { %3290 = vst [vmem:[#allocation40_spill] sm:$0xff] %v2572_v11  ;;  %3291 = vst [vmem:[#allocation41_spill] sm:$0xff] %v2576_v47  ;;  %v2595_v61 = vsub.f32 %v33_v34, %v2582_v55  ;;  %v3192_v26 = vand.u32 4294901760, %v2417_v25  ;;  %v3197_v12 = vand.u32 4294901760, %v2421_v27  ;;  %v3216_v24 = vand.u32 4294901760, %v2433_v42 }
  0x36   :  { %3292 = vst [vmem:[#allocation42_spill] sm:$0xff] %v2578_v46  ;;  %3293 = vst [vmem:[#allocation43_spill] sm:$0xff] %v2580_v9  ;;  %v193_v59 = vsub.f32 %v2409_v18, %v3296_v6  ;;  %v205_v22 = vsub.f32 %v2411_v19, %v3297_v39  ;;  %2157 = vmatpush3.bf16.msra.mxu1 %v2570_v23  ;;  %v1032_v6 = vsub.f32 %v2413_v20, %v3181_v40 }
  0x37   :  { %3294 = vst [vmem:[#allocation44_spill] sm:$0xff] %v2582_v55  ;;  %3295 = vst [vmem:[#allocation45_spill] sm:$0xff] %v2585_v57  ;;  %1973 = vmatpush1.bf16.msra.mxu0 %v2578_v46  ;;  %2158 = vmatprep.subr.bf16.mxu1 %v3280_v44  ;;  %v2608_v34 = vand.u32 4294901760, %v2595_v61  ;;  %v1039_v31 = vsub.f32 %v2417_v25, %v3192_v26  ;;  %v3301_v46 = vand.u32 4294901760, %v2431_v41 }
  0x38   :  { %3298 = vst [vmem:[#allocation46_spill] sm:$0xff] %v2595_v61  ;;  %v194_v32 = vand.u32 4294901760, %v193_v59  ;;  %v206_v49 = vand.u32 4294901760, %v205_v22  ;;  %v199_v59 = vsub.f32 %v2421_v27, %v3197_v12  ;;  %v3300_v22 = vand.u32 4294901760, %v2424_v29 }
  0x39   :  { %3299 = vst [vmem:[#allocation47_spill] sm:$0xff] %v2608_v34  ;;  %v1033_v23 = vand.u32 4294901760, %v1032_v6  ;;  %v217_v1 = vsub.f32 %v2431_v41, %v3301_v46  ;;  %v182_v55 = vsub.f32 %v2595_v61, %v2608_v34  ;;  %v1040_v26 = vand.u32 4294901760, %v1039_v31 }
  0x3a   :  { %v211_v40 = vsub.f32 %v2424_v29, %v3300_v22  ;;  %v1974_v39 = vpack.c.bf16 %v206_v49, %v194_v32  ;;  %v200_v25 = vand.u32 4294901760, %v199_v59  ;;  %v229_v22 = vsub.f32 %v2433_v42, %v3216_v24 }
  0x3b   :  { %v218_v12 = vand.u32 4294901760, %v217_v1  ;;  %v3209_v49 = vand.u32 4294901760, %v2435_v43  ;;  %v3205_v32 = vand.u32 4294901760, %v2439_v48  ;;  %v183_v6 = vand.u32 4294901760, %v182_v55 }
  0x3c   :  { %v212_v20 = vand.u32 4294901760, %v211_v40  ;;  %1975 = vmatprep.subr.bf16.mxu0 %v1974_v39  ;;  %v2159_v46 = vpack.c.bf16 %v1040_v26, %v1033_v23  ;;  %v3204_v29 = vand.u32 4294901760, %v2443_v50  ;;  %v230_v27 = vand.u32 4294901760, %v229_v22 }
  0x3d   :  { %v1046_v40 = vsub.f32 %v2435_v43, %v3209_v49  ;;  %v1053_v1 = vsub.f32 %v2439_v48, %v3205_v32  ;;  %v3207_v31 = vand.u32 4294901760, %v2446_v52  ;;  %1765 = vmatmul.mubr.f32.vlgmr.msra.gmra.mrb[0].mxu1 %v183_v6  ;;  %184 = vmatmul.mubr.f32.vlgmr.msra.gmra.mrb[0].mxu0 %v183_v6  ;;  %v3210_v23 = vand.u32 4294901760, %v2457_v2 }
  0x3e   :  { %v1976_v41 = vpack.c.bf16 %v212_v20, %v200_v25  ;;  %v223_v55 = vsub.f32 %v2443_v50, %v3204_v29  ;;  %v3206_v20 = vand.u32 4294901760, %v2448_v54  ;;  %v3208_v25 = vand.u32 4294901760, %v2455_v63  ;;  %2160 = vmatpush3.bf16.msra.mxu1 %v2159_v46 }
  0x3f   :  { %v1978_v26 = vpack.c.bf16 %v230_v27, %v218_v12  ;;  %v1047_v39 = vand.u32 4294901760, %v1046_v40  ;;  %v1054_v59 = vand.u32 4294901760, %v1053_v1  ;;  %v235_v22 = vsub.f32 %v2446_v52, %v3207_v31  ;;  %2161 = vmatprep.subr.bf16.mxu1 %v3280_v44 }
  0x40   :  { %1977 = vmatpush1.bf16.msra.mxu0 %v1976_v41  ;;  %v224_v6 = vand.u32 4294901760, %v223_v55  ;;  %v241_v29 = vsub.f32 %v2448_v54, %v3206_v20  ;;  %v253_v32 = vsub.f32 %v2455_v63, %v3208_v25  ;;  %v1060_v27 = vsub.f32 %v2457_v2, %v3210_v23 }
  0x41   :  { %v3302_v41 = vmov 0.0   ;;  %1979 = vmatprep.subr.bf16.mxu0 %v1978_v26  ;;  %v2162_v12 = vpack.c.bf16 %v1054_v59, %v1047_v39  ;;  %v236_v46 = vand.u32 4294901760, %v235_v22  ;;  %v3214_v40 = vand.u32 4294901760, %v2461_v8 }
  0x42   :  { %1799 = vmatprep.mubr.msk.f32.mxu1 %vm2363_vm0, %v3302_v41  ;;  %v3211_v1 = vand.u32 4294901760, %v2465_v10  ;;  %414 = vmatprep.mubr.f32.mxu0 %v3302_v41  ;;  %v242_v55 = vand.u32 4294901760, %v241_v29  ;;  %v254_v20 = vand.u32 4294901760, %v253_v32  ;;  %v1061_v31 = vand.u32 4294901760, %v1060_v27 }
  0x43   :  { %v3213_v25 = vand.u32 4294901760, %v2468_v14  ;;  %2163 = vmatpush3.bf16.msra.mxu1 %v2162_v12  ;;  %v1980_v49 = vpack.c.bf16 %v236_v46, %v224_v6  ;;  %v1067_v23 = vsub.f32 %v2461_v8, %v3214_v40  ;;  %v3212_v39 = vand.u32 4294901760, %v2472_v16 }
  0x44   :  { %v247_v26 = vsub.f32 %v2465_v10, %v3211_v1  ;;  %2164 = vmatprep.subr.bf16.mxu1 %v3280_v44  ;;  %v1982_v59 = vpack.c.bf16 %v254_v20, %v242_v55  ;;  %v3215_v32 = vand.u32 4294901760, %v2474_v21  ;;  %v3231_v22 = vand.u32 4294901760, %v2482_v37 }
  0x45   :  { %v259_v29 = vsub.f32 %v2468_v14, %v3213_v25  ;;  %1981 = vmatpush1.bf16.msra.mxu0 %v1980_v49  ;;  %v1068_v6 = vand.u32 4294901760, %v1067_v23  ;;  %v265_v12 = vsub.f32 %v2472_v16, %v3212_v39  ;;  %v3223_v46 = vand.u32 4294901760, %v2484_v38 }
  0x46   :  { %v248_v27 = vand.u32 4294901760, %v247_v26  ;;  %1983 = vmatprep.subr.bf16.mxu0 %v1982_v59  ;;  %v277_v20 = vsub.f32 %v2474_v21, %v3215_v32  ;;  %v1074_v55 = vsub.f32 %v2482_v37, %v3231_v22  ;;  %v3217_v49 = vand.u32 4294901760, %v2488_v51 }
  0x47   :  { %v260_v1 = vand.u32 4294901760, %v259_v29  ;;  %v2165_v23 = vpack.c.bf16 %v1068_v6, %v1061_v31  ;;  %v266_v26 = vand.u32 4294901760, %v265_v12  ;;  %v1081_v39 = vsub.f32 %v2484_v38, %v3223_v46 }
  0x48   :  { %v3218_v25 = vand.u32 4294901760, %v2490_v53  ;;  %v278_v29 = vand.u32 4294901760, %v277_v20  ;;  %v1075_v40 = vand.u32 4294901760, %v1074_v55  ;;  %v271_v32 = vsub.f32 %v2488_v51, %v3217_v49 }
  0x49   :  { %v1984_v59 = vpack.c.bf16 %v260_v1, %v248_v27  ;;  %2166 = vmatpush3.bf16.msra.mxu1 %v2165_v23  ;;  %v1082_v24 = vand.u32 4294901760, %v1081_v39  ;;  %v3219_v6 = vand.u32 4294901760, %v2494_v56  ;;  %v3220_v12 = vand.u32 4294901760, %v2498_v60 }
  0x4a   :  { %v283_v31 = vsub.f32 %v2490_v53, %v3218_v25  ;;  %2167 = vmatprep.subr.bf16.mxu1 %v3280_v44  ;;  %v1986_v1 = vpack.c.bf16 %v278_v29, %v266_v26  ;;  %v272_v27 = vand.u32 4294901760, %v271_v32  ;;  %v3221_v20 = vand.u32 4294901760, %v2502_v3 }
  0x4b   :  { %1985 = vmatpush1.bf16.msra.mxu0 %v1984_v59  ;;  %v3222_v55 = vand.u32 4294901760, %v2506_v5  ;;  %v2168_v49 = vpack.c.bf16 %v1082_v24, %v1075_v40  ;;  %v289_v39 = vsub.f32 %v2494_v56, %v3219_v6  ;;  %v301_v25 = vsub.f32 %v2498_v60, %v3220_v12 }
  0x4c   :  { %v284_v23 = vand.u32 4294901760, %v283_v31  ;;  %1987 = vmatprep.subr.bf16.mxu0 %v1986_v1  ;;  %v1088_v26 = vsub.f32 %v2502_v3, %v3221_v20  ;;  %v3224_v24 = vand.u32 4294901760, %v2508_v30  ;;  %v3226_v40 = vand.u32 4294901760, %v2512_v36 }
  0x4d   :  { %v1095_v32 = vsub.f32 %v2506_v5, %v3222_v55  ;;  %2169 = vmatpush3.bf16.msra.mxu1 %v2168_v49  ;;  %v290_v29 = vand.u32 4294901760, %v289_v39  ;;  %v302_v31 = vand.u32 4294901760, %v301_v25  ;;  %v3225_v6 = vand.u32 4294901760, %v2516_v13 }
  0x4e   :  { %v1988_v59 = vpack.c.bf16 %v284_v23, %v272_v27  ;;  %2170 = vmatprep.subr.bf16.mxu1 %v3280_v44  ;;  %v1089_v1 = vand.u32 4294901760, %v1088_v26  ;;  %v295_v20 = vsub.f32 %v2508_v30, %v3224_v24  ;;  %v307_v55 = vsub.f32 %v2512_v36, %v3226_v40 }
  0x4f   :  { %v1096_v12 = vand.u32 4294901760, %v1095_v32  ;;  %v1990_v46 = vpack.c.bf16 %v302_v31, %v290_v29  ;;  %v313_v25 = vsub.f32 %v2516_v13, %v3225_v6  ;;  %v3230_v49 = vand.u32 4294901760, %v2519_v35  ;;  %v3303_v31 = vld [vmem:[#allocation31_spill] sm:$0xff] }
  0x50   :  { %1989 = vmatpush1.bf16.msra.mxu0 %v1988_v59  ;;  %v3227_v27 = vand.u32 4294901760, %v2523_v7  ;;  %v296_v39 = vand.u32 4294901760, %v295_v20  ;;  %v308_v26 = vand.u32 4294901760, %v307_v55  ;;  %v3228_v32 = vand.u32 4294901760, %v2525_v62 }
  0x51   :  { %v2171_v23 = vpack.c.bf16 %v1096_v12, %v1089_v1  ;;  %1991 = vmatprep.subr.bf16.mxu0 %v1990_v46  ;;  %v314_v24 = vand.u32 4294901760, %v313_v25  ;;  %v325_v59 = vsub.f32 %v2519_v35, %v3230_v49  ;;  %v3229_v6 = vand.u32 4294901760, %v3303_v31 }
  0x52   :  { %v1102_v29 = vsub.f32 %v2523_v7, %v3227_v27  ;;  %v1992_v40 = vpack.c.bf16 %v308_v26, %v296_v39  ;;  %v1109_v12 = vsub.f32 %v2525_v62, %v3228_v32  ;;  %v3232_v20 = vand.u32 4294901760, %v2534_v58 }
  0x53   :  { %2172 = vmatpush3.bf16.msra.mxu1 %v2171_v23  ;;  %v3236_v46 = vand.u32 4294901760, %v2538_v33  ;;  %v326_v55 = vand.u32 4294901760, %v325_v59  ;;  %v319_v25 = vsub.f32 %v3303_v31, %v3229_v6  ;;  %v3235_v27 = vand.u32 4294901760, %v2541_v0 }
  0x54   :  { %2173 = vmatprep.subr.bf16.mxu1 %v3280_v44  ;;  %v1103_v1 = vand.u32 4294901760, %v1102_v29  ;;  %1993 = vmatpush1.bf16.msra.mxu0 %v1992_v40  ;;  %v1110_v23 = vand.u32 4294901760, %v1109_v12  ;;  %v331_v39 = vsub.f32 %v2534_v58, %v3232_v20  ;;  %v3242_v32 = vand.u32 4294901760, %v2545_v17 }
  0x55   :  { %v337_v26 = vsub.f32 %v2538_v33, %v3236_v46  ;;  %v1994_v59 = vpack.c.bf16 %v326_v55, %v314_v24  ;;  %v320_v29 = vand.u32 4294901760, %v319_v25  ;;  %v349_v6 = vsub.f32 %v2541_v0, %v3235_v27 }
  0x56   :  { %v3237_v49 = vand.u32 4294901760, %v2547_v45  ;;  %v2174_v40 = vpack.c.bf16 %v1110_v23, %v1103_v1  ;;  %v332_v12 = vand.u32 4294901760, %v331_v39  ;;  %v1116_v20 = vsub.f32 %v2545_v17, %v3242_v32  ;;  %v3304_v1 = vld [vmem:[#allocation36_spill] sm:$0xff] }
  0x57   :  { %v338_v22 = vand.u32 4294901760, %v337_v26  ;;  %1995 = vmatprep.subr.bf16.mxu0 %v1994_v59  ;;  %v350_v34 = vand.u32 4294901760, %v349_v6  ;;  %v3238_v55 = vand.u32 4294901760, %v2553_v28  ;;  %v3239_v25 = vand.u32 4294901760, %v2555_v4 }
  0x58   :  { %v1123_v24 = vsub.f32 %v2547_v45, %v3237_v49  ;;  %2175 = vmatpush3.bf16.msra.mxu1 %v2174_v40  ;;  %v1996_v27 = vpack.c.bf16 %v332_v12, %v320_v29  ;;  %v1117_v46 = vand.u32 4294901760, %v1116_v20  ;;  %v3240_v23 = vand.u32 4294901760, %v3304_v1 }
  0x59   :  { %v3241_v39 = vand.u32 4294901760, %v2568_v15  ;;  %2176 = vmatprep.subr.bf16.mxu1 %v3280_v44  ;;  %v1998_v26 = vpack.c.bf16 %v350_v34, %v338_v22  ;;  %v343_v6 = vsub.f32 %v2553_v28, %v3238_v55  ;;  %v355_v49 = vsub.f32 %v2555_v4, %v3239_v25 }
  0x5a   :  { %v1124_v59 = vand.u32 4294901760, %v1123_v24  ;;  %1997 = vmatpush1.bf16.msra.mxu0 %v1996_v27  ;;  %v361_v20 = vsub.f32 %v3304_v1, %v3240_v23  ;;  %v3243_v34 = vand.u32 4294901760, %v2572_v11  ;;  %v3244_v22 = vand.u32 4294901760, %v2576_v47 }
  0x5b   :  { %v373_v29 = vsub.f32 %v2568_v15, %v3241_v39  ;;  %1999 = vmatprep.subr.bf16.mxu0 %v1998_v26  ;;  %v344_v12 = vand.u32 4294901760, %v343_v6  ;;  %v356_v24 = vand.u32 4294901760, %v355_v49  ;;  %v3245_v55 = vand.u32 4294901760, %v2580_v9 }
  0x5c   :  { %v2177_v40 = vpack.c.bf16 %v1124_v59, %v1117_v46  ;;  %v362_v25 = vand.u32 4294901760, %v361_v20  ;;  %v1130_v23 = vsub.f32 %v2572_v11, %v3243_v34  ;;  %v1137_v39 = vsub.f32 %v2576_v47, %v3244_v22 }
  0x5d   :  { %v374_v27 = vand.u32 4294901760, %v373_v29  ;;  %v2000_v32 = vpack.c.bf16 %v356_v24, %v344_v12  ;;  %v367_v46 = vsub.f32 %v2580_v9, %v3245_v55  ;;  %v378_v49 = vand.u32 4294901760, %v2585_v57  ;;  %v3305_v12 = vld [vmem:[#allocation10_spill] sm:$0xff]  ;;  %v3306_v24 = vld [vmem:[#allocation12_spill] sm:$0xff] }
  0x5e   :  { %2178 = vmatpush3.bf16.msra.mxu1 %v2177_v40  ;;  %v1131_v59 = vand.u32 4294901760, %v1130_v23  ;;  %v1138_v6 = vand.u32 4294901760, %v1137_v39  ;;  %v2006_v40 = vpack.c.bf16 %v2411_v19, %v2409_v18  ;;  %v2183_v55 = vpack.c.bf16 %v3306_v24, %v3305_v12  ;;  %v3308_v23 = vld [vmem:[#allocation15_spill] sm:$0xff] }
  0x5f   :  { %2179 = vmatprep.subr.bf16.mxu1 %v3280_v44  ;;  %v2002_v26 = vpack.c.bf16 %v374_v27, %v362_v25  ;;  %2001 = vmatpush1.bf16.msra.mxu0 %v2000_v32  ;;  %v368_v20 = vand.u32 4294901760, %v367_v46  ;;  %v379_v29 = vsub.f32 %v2585_v57, %v378_v49  ;;  %v3307_v25 = vld [vmem:[#allocation14_spill] sm:$0xff]  ;;  %v3309_v32 = vld [vmem:[#allocation17_spill] sm:$0xff]  ;;  %v2186_v46 = vpack.c.bf16 %v2439_v48, %v2435_v43 }
  0x60   :  { %v2180_v34 = vpack.c.bf16 %v1138_v6, %v1131_v59  ;;  %v2008_v39 = vpack.c.bf16 %v3308_v23, %v3307_v25  ;;  %v2010_v27 = vpack.c.bf16 %v2433_v42, %v3309_v32  ;;  %v2189_v59 = vpack.c.bf16 %v2461_v8, %v2457_v2 }
  0x61   :  { %2003 = vmatprep.subr.bf16.mxu0 %v2002_v26  ;;  %v380_v22 = vand.u32 4294901760, %v379_v29  ;;  %v2012_v26 = vpack.c.bf16 %v2446_v52, %v2443_v50  ;;  %v3311_v6 = vand.u32 4294901760, %v2409_v18  ;;  %v3314_v57 = vand.u32 4294901760, %v3306_v24 }
  0x62   :  { %2181 = vmatpush3.bf16.msra.mxu1 %v2180_v34  ;;  %v3310_v34 = vld [vmem:[#allocation44_spill] sm:$0xff]  ;;  %v3315_v47 = vand.u32 4294901760, %v3307_v25  ;;  %v3316_v11 = vand.u32 4294901760, %v3308_v23  ;;  %v3317_v18 = vand.u32 4294901760, %v3309_v32  ;;  %v3323_v25 = vand.u32 4294901760, %v2448_v54 }
  0x63   :  { %v2004_v61 = vpack.c.bf16 %v380_v22, %v368_v20  ;;  %2182 = vmatprep.subr.bf16.mxu1 %v3280_v44  ;;  %v2014_v22 = vpack.c.bf16 %v2455_v63, %v2448_v54  ;;  %v3312_v20 = vand.u32 4294901760, %v2411_v19  ;;  %v3318_v19 = vand.u32 4294901760, %v2433_v42 }
  0x64   :  { %v2830_v15 = vpack.c.bf16 %v3316_v11, %v3315_v47  ;;  %v3321_v11 = vand.u32 4294901760, %v2443_v50  ;;  %v3322_v47 = vand.u32 4294901760, %v2446_v52  ;;  %v3324_v42 = vand.u32 4294901760, %v2455_v63 }
  0x65   :  { %2005 = vmatpush1.bf16.msra.mxu0 %v2004_v61  ;;  %1800 = vmatmul.mubr.f32.vlgmr.msra.gmra.mrb[0].mxu1 %v3310_v34  ;;  %v2818_v29 = vpack.c.bf16 %v3312_v20, %v3311_v6  ;;  %v3313_v61 = vand.u32 4294901760, %v3305_v12  ;;  %v3327_v50 = vand.u32 4294901760, %v2465_v10  ;;  %v3328_v52 = vand.u32 4294901760, %v2468_v14 }
  0x66   :  { %2007 = vmatprep.subr.bf16.mxu0 %v2006_v40  ;;  %2184 = vmatpush3.bf16.msra.mxu1 %v2183_v55  ;;  %v2839_v55 = vpack.c.bf16 %v3318_v19, %v3317_v18  ;;  %v3320_v40 = vand.u32 4294901760, %v2439_v48  ;;  %v2851_v24 = vpack.c.bf16 %v3322_v47, %v3321_v11  ;;  %v2858_v23 = vpack.c.bf16 %v3324_v42, %v3323_v25 }
  0x67   :  { %v2824_v9 = vpack.c.bf16 %v3314_v57, %v3313_v61  ;;  %2185 = vmatprep.subr.bf16.mxu1 %v3280_v44  ;;  %1834 = vmatprep.mubr.msk.f32.mxu1 %vm2363_vm0, %v3302_v41  ;;  %v3319_v57 = vand.u32 4294901760, %v2435_v43  ;;  %v3325_v43 = vand.u32 4294901760, %v2457_v2  ;;  %v3326_v48 = vand.u32 4294901760, %v2461_v8 }
  0x68   :  { %416 = vmatmul.mubr.f32.vlgmr.msra.gmra.mrb[0].mxu0 %v3310_v34  ;;  %v2870_v6 = vpack.c.bf16 %v3328_v52, %v3327_v50  ;;  %v3329_v20 = vand.u32 4294901760, %v2472_v16  ;;  %v3330_v54 = vand.u32 4294901760, %v2474_v21  ;;  %v3331_v63 = vand.u32 4294901760, %v2482_v37 }
  0x69   :  { %v2845_v12 = vpack.c.bf16 %v3320_v40, %v3319_v57  ;;  %v2864_v32 = vpack.c.bf16 %v3326_v48, %v3325_v43  ;;  %2009 = vmatpush1.bf16.msra.mxu0 %v2008_v39  ;;  %550 = vmatprep.mubr.f32.mxu0 %v3302_v41  ;;  %v3332_v2 = vand.u32 4294901760, %v2484_v38  ;;  %v3333_v18 = vand.u32 4294901760, %v2488_v51 }
  0x6a   :  { %v2876_v61 = vpack.c.bf16 %v3330_v54, %v3329_v20  ;;  %v3334_v19 = vand.u32 4294901760, %v2490_v53  ;;  %v3335_v40 = vand.u32 4294901760, %v2494_v56  ;;  %v3336_v11 = vand.u32 4294901760, %v2498_v60  ;;  %2011 = vmatprep.subr.bf16.mxu0 %v2010_v27  ;;  %2187 = vmatpush3.bf16.msra.mxu1 %v2186_v46 }
  0x6b   :  { %v2883_v8 = vpack.c.bf16 %v3332_v2, %v3331_v63  ;;  %v3337_v39 = vand.u32 4294901760, %v2502_v3  ;;  %v3338_v25 = vand.u32 4294901760, %v2506_v5  ;;  %v3339_v43 = vand.u32 4294901760, %v2508_v30  ;;  %2188 = vmatprep.subr.bf16.mxu1 %v3280_v44 }
  0x6c   :  { %v2889_v57 = vpack.c.bf16 %v3334_v19, %v3333_v18  ;;  %v2895_v47 = vpack.c.bf16 %v3336_v11, %v3335_v40  ;;  %v3340_v48 = vand.u32 4294901760, %v2512_v36  ;;  %v3341_v52 = vand.u32 4294901760, %v2516_v13 }
  0x6d   :  { %v2901_v42 = vpack.c.bf16 %v3338_v25, %v3337_v39  ;;  %v3342_v20 = vand.u32 4294901760, %v2519_v35  ;;  %v3343_v27 = vand.u32 4294901760, %v2523_v7  ;;  %v3344_v46 = vand.u32 4294901760, %v2525_v62  ;;  %2013 = vmatpush1.bf16.msra.mxu0 %v2012_v26  ;;  %v3382_v26 = vld [vmem:[#allocation28_spill] sm:$0xff] }
  0x6e   :  { %v2907_v50 = vpack.c.bf16 %v3340_v48, %v3339_v43  ;;  %v3346_v2 = vand.u32 4294901760, %v3303_v31  ;;  %v3347_v18 = vand.u32 4294901760, %v2534_v58  ;;  %v3349_v40 = vand.u32 4294901760, %v2538_v33  ;;  %2015 = vmatprep.subr.bf16.mxu0 %v2014_v22  ;;  %2190 = vmatpush3.bf16.msra.mxu1 %v2189_v59  ;;  %v3383_v22 = vld [vmem:[#allocation29_spill] sm:$0xff]  ;;  %v3384_v59 = vld [vmem:[#allocation30_spill] sm:$0xff] }
  0x6f   :  { %v2913_v54 = vpack.c.bf16 %v3342_v20, %v3341_v52  ;;  %v2920_v63 = vpack.c.bf16 %v3344_v46, %v3343_v27  ;;  %v3350_v11 = vand.u32 4294901760, %v2541_v0  ;;  %v3352_v25 = vand.u32 4294901760, %v2545_v17  ;;  %2191 = vmatprep.subr.bf16.mxu1 %v3280_v44 }
  0x70   :  { %v2926_v19 = vpack.c.bf16 %v3347_v18, %v3346_v2  ;;  %v3353_v43 = vand.u32 4294901760, %v2547_v45  ;;  %v3355_v52 = vand.u32 4294901760, %v2553_v28  ;;  %v3356_v20 = vand.u32 4294901760, %v2555_v4  ;;  %v3358_v2 = vld [vmem:[#allocation38_spill] sm:$0xff] }
  0x71   :  { %3345 = vst [vmem:[#allocation31_spill] sm:$0xff] %v2920_v63  ;;  %v2932_v39 = vpack.c.bf16 %v3350_v11, %v3349_v40  ;;  %v3357_v46 = vand.u32 4294901760, %v3304_v1  ;;  %v3359_v18 = vand.u32 4294901760, %v3358_v2  ;;  %v3360_v40 = vld [vmem:[#allocation40_spill] sm:$0xff] }
  0x72   :  { %3348 = vst [vmem:[#allocation36_spill] sm:$0xff] %v2926_v19  ;;  %v2938_v48 = vpack.c.bf16 %v3353_v43, %v3352_v25  ;;  %v2944_v27 = vpack.c.bf16 %v3356_v20, %v3355_v52  ;;  %v3361_v11 = vand.u32 4294901760, %v3360_v40  ;;  %v3364_v25 = vld [vmem:[#allocation43_spill] sm:$0xff]  ;;  %v2016_v52 = vpack.c.bf16 %v2468_v14, %v2465_v10 }
  0x73   :  { %3351 = vst [vmem:[#allocation10_spill] sm:$0xff] %v2932_v39  ;;  %v2950_v34 = vpack.c.bf16 %v3359_v18, %v3357_v46  ;;  %v3362_v39 = vld [vmem:[#allocation41_spill] sm:$0xff]  ;;  %v3365_v43 = vand.u32 4294901760, %v3364_v25  ;;  %v2018_v20 = vpack.c.bf16 %v2474_v21, %v2472_v16  ;;  %v2192_v46 = vpack.c.bf16 %v2484_v38, %v2482_v37  ;;  %v3387_v18 = vld [vmem:[#allocation34_spill] sm:$0xff] }
  0x74   :  { %3354 = vst [vmem:[#allocation12_spill] sm:$0xff] %v2938_v48  ;;  %v3363_v19 = vand.u32 4294901760, %v3362_v39  ;;  %2017 = vmatpush1.bf16.msra.mxu0 %v2016_v52  ;;  %v2195_v10 = vpack.c.bf16 %v2506_v5, %v2502_v3  ;;  %v2024_v14 = vpack.c.bf16 %v2512_v36, %v2508_v30  ;;  %v2026_v16 = vpack.c.bf16 %v2519_v35, %v2516_v13  ;;  %v3370_v3 = vld [vmem:[#allocation13_spill] sm:$0xff]  ;;  %v3371_v5 = vld [vmem:[#allocation16_spill] sm:$0xff]  ;;  %v3372_v30 = vld [vmem:[#allocation18_spill] sm:$0xff] }
  0x75   :  { %v2960_v48 = vpack.c.bf16 %v378_v49, %v3365_v43  ;;  %2019 = vmatprep.subr.bf16.mxu0 %v2018_v20  ;;  %2193 = vmatpush3.bf16.msra.mxu1 %v2192_v46  ;;  %v2022_v49 = vpack.c.bf16 %v2498_v60, %v2494_v56  ;;  %v2198_v21 = vpack.c.bf16 %v2525_v62, %v2523_v7  ;;  %v3368_v56 = vld [vmem:[#allocation9_spill] sm:$0xff]  ;;  %v3369_v60 = vld [vmem:[#allocation11_spill] sm:$0xff]  ;;  %v3374_v13 = vld [vmem:[#allocation20_spill] sm:$0xff] }
  0x76   :  { %v2956_v63 = vpack.c.bf16 %v3363_v19, %v3361_v11  ;;  %v2020_v19 = vpack.c.bf16 %v2490_v53, %v2488_v51  ;;  %2194 = vmatprep.subr.bf16.mxu1 %v3280_v44  ;;  %v2028_v37 = vpack.c.bf16 %v2534_v58, %v3303_v31  ;;  %v2030_v38 = vpack.c.bf16 %v2541_v0, %v2538_v33  ;;  %v3366_v0 = vld [vmem:[#allocation45_spill] sm:$0xff]  ;;  %v3367_v53 = vld [vmem:[#allocation46_spill] sm:$0xff]  ;;  %v3373_v33 = vld [vmem:[#allocation19_spill] sm:$0xff] }
  0x77   :  { %v2201_v36 = vpack.c.bf16 %v2547_v45, %v2545_v17  ;;  %v2032_v62 = vpack.c.bf16 %v2555_v4, %v2553_v28  ;;  %v2034_v7 = vpack.c.bf16 %v3358_v2, %v3304_v1  ;;  %v2204_v51 = vpack.c.bf16 %v3362_v39, %v3360_v40  ;;  %v3375_v35 = vld [vmem:[#allocation21_spill] sm:$0xff]  ;;  %v3376_v45 = vld [vmem:[#allocation22_spill] sm:$0xff]  ;;  %v3377_v58 = vld [vmem:[#allocation23_spill] sm:$0xff] }
  0x78   :  { %2021 = vmatpush1.bf16.msra.mxu0 %v2020_v19  ;;  %v2036_v17 = vpack.c.bf16 %v3366_v0, %v3364_v25  ;;  %v3378_v28 = vld [vmem:[#allocation24_spill] sm:$0xff]  ;;  %v3379_v4 = vld [vmem:[#allocation25_spill] sm:$0xff]  ;;  %v3380_v31 = vld [vmem:[#allocation26_spill] sm:$0xff] }
  0x79   :  { %2023 = vmatprep.subr.bf16.mxu0 %v2022_v49  ;;  %2196 = vmatpush3.bf16.msra.mxu1 %v2195_v10  ;;  %v3381_v1 = vld [vmem:[#allocation27_spill] sm:$0xff]  ;;  %v3385_v39 = vld [vmem:[#allocation32_spill] sm:$0xff]  ;;  %v3386_v2 = vld [vmem:[#allocation33_spill] sm:$0xff] }
  0x7a   :  { %2197 = vmatprep.subr.bf16.mxu1 %v3280_v44  ;;  %v3388_v40 = vld [vmem:[#allocation35_spill] sm:$0xff]  ;;  %v3389_v11 = vld [vmem:[#allocation37_spill] sm:$0xff]  ;;  %v3391_v43 = vld [vmem:[#allocation42_spill] sm:$0xff] }
  0x7b   :  { %v3390_v25 = vld [vmem:[#allocation39_spill] sm:$0xff] }
  0x7c   :  { %2025 = vmatpush1.bf16.msra.mxu0 %v2024_v14  ;;  %v3392_v52 = vld [vmem:[#allocation47_spill] sm:$0xff] }
  0x7d   :  { %2027 = vmatprep.subr.bf16.mxu0 %v2026_v16  ;;  %2199 = vmatpush3.bf16.msra.mxu1 %v2198_v21 }
  0x7e   :  { %2200 = vmatprep.subr.bf16.mxu1 %v3280_v44 }
  0x80   :  { %2029 = vmatpush1.bf16.msra.mxu0 %v2028_v37 }
  0x81   :  { %2031 = vmatprep.subr.bf16.mxu0 %v2030_v38  ;;  %2202 = vmatpush3.bf16.msra.mxu1 %v2201_v36 }
  0x82   :  { %2203 = vmatprep.subr.bf16.mxu1 %v3280_v44 }
  0x84   :  { %2033 = vmatpush1.bf16.msra.mxu0 %v2032_v62 }
  0x85   :  { %2035 = vmatprep.subr.bf16.mxu0 %v2034_v7  ;;  %2205 = vmatpush3.bf16.msra.mxu1 %v2204_v51 }
  0x86   :  { %2206 = vmatprep.subr.bf16.mxu1 %v3280_v44 }
  0x88   :  { %2037 = vmatpush1.bf16.msra.mxu0 %v2036_v17  ;;  %1835 = vmatmul.mubr.f32.vlgmr.msra.gmra.mrb[0].mxu1 %v3367_v53 }
  0x89   :  { %2039 = vmatprep.subr.bf16.mxu0 %v3368_v56  ;;  %2208 = vmatpush3.bf16.msra.mxu1 %v3369_v60 }
  0x8a   :  { %2209 = vmatprep.subr.bf16.mxu1 %v3280_v44  ;;  %1869 = vmatprep.mubr.msk.f32.mxu1 %vm2363_vm0, %v3302_v41 }
  0x8b   :  { %553 = vmatmul.mubr.f32.vlgmr.msra.gmra.mrb[0].mxu0 %v3367_v53 }
  0x8c   :  { %2041 = vmatpush1.bf16.msra.mxu0 %v3370_v3  ;;  %655 = vmatprep.mubr.f32.mxu0 %v3302_v41 }
  0x8d   :  { %2043 = vmatprep.subr.bf16.mxu0 %v3371_v5  ;;  %2211 = vmatpush3.bf16.msra.mxu1 %v3372_v30 }
  0x8e   :  { %2212 = vmatprep.subr.bf16.mxu1 %v3280_v44 }
  0x90   :  { %2045 = vmatpush1.bf16.msra.mxu0 %v3373_v33 }
  0x91   :  { %2047 = vmatprep.subr.bf16.mxu0 %v3374_v13  ;;  %2214 = vmatpush3.bf16.msra.mxu1 %v3375_v35 }
  0x92   :  { %2215 = vmatprep.subr.bf16.mxu1 %v3280_v44 }
  0x94   :  { %2049 = vmatpush1.bf16.msra.mxu0 %v3376_v45 }
  0x95   :  { %2051 = vmatprep.subr.bf16.mxu0 %v3377_v58  ;;  %2217 = vmatpush3.bf16.msra.mxu1 %v3378_v28 }
  0x96   :  { %2218 = vmatprep.subr.bf16.mxu1 %v3280_v44 }
  0x98   :  { %2053 = vmatpush1.bf16.msra.mxu0 %v3379_v4 }
  0x99   :  { %2055 = vmatprep.subr.bf16.mxu0 %v3380_v31  ;;  %2220 = vmatpush3.bf16.msra.mxu1 %v3381_v1 }
  0x9a   :  { %2221 = vmatprep.subr.bf16.mxu1 %v3280_v44 }
  0x9c   :  { %2057 = vmatpush1.bf16.msra.mxu0 %v3382_v26 }
  0x9d   :  { %2059 = vmatprep.subr.bf16.mxu0 %v3383_v22  ;;  %2223 = vmatpush3.bf16.msra.mxu1 %v3384_v59 }
  0x9e   :  { %2224 = vmatprep.subr.bf16.mxu1 %v3280_v44 }
  0xa0   :  { %2061 = vmatpush1.bf16.msra.mxu0 %v3385_v39 }
  0xa1   :  { %2063 = vmatprep.subr.bf16.mxu0 %v3386_v2  ;;  %2226 = vmatpush3.bf16.msra.mxu1 %v3387_v18 }
  0xa2   :  { %2227 = vmatprep.subr.bf16.mxu1 %v3280_v44 }
  0xa4   :  { %2065 = vmatpush1.bf16.msra.mxu0 %v3388_v40 }
  0xa5   :  { %2067 = vmatprep.subr.bf16.mxu0 %v3389_v11  ;;  %2229 = vmatpush3.bf16.msra.mxu1 %v3390_v25 }
  0xa6   :  { %2230 = vmatprep.subr.bf16.mxu1 %v3280_v44 }
  0xa8   :  { %2069 = vmatpush1.bf16.msra.mxu0 %v3391_v43  ;;  %1870 = vmatmul.mubr.f32.vlgmr.msra.gmra.mrb[0].mxu1 %v3392_v52 }
  0xa9   :  { %2071 = vmatprep.subr.bf16.mxu0 %v2818_v29  ;;  %2232 = vmatpush3.bf16.msra.mxu1 %v2824_v9  ;;  %v3393_v9 = vld [vmem:[#allocation31_spill] sm:$0xff]  ;;  %v3395_v29 = vld [vmem:[#allocation10_spill] sm:$0xff] }
  0xaa   :  { %2233 = vmatprep.subr.bf16.mxu1 %v3280_v44  ;;  %1904 = vmatprep.mubr.msk.f32.mxu1 %vm2363_vm0, %v3302_v41 }
  0xab   :  { %659 = vmatmul.mubr.f32.vlgmr.msra.gmra.mrb[0].mxu0 %v3392_v52 }
  0xac   :  { %2073 = vmatpush1.bf16.msra.mxu0 %v2830_v15  ;;  %825 = vmatprep.mubr.f32.mxu0 %v3302_v41  ;;  %v3394_v15 = vld [vmem:[#allocation36_spill] sm:$0xff] }
  0xad   :  { %2075 = vmatprep.subr.bf16.mxu0 %v2839_v55  ;;  %2235 = vmatpush3.bf16.msra.mxu1 %v2845_v12  ;;  %v3396_v55 = vld [vmem:[#allocation12_spill] sm:$0xff] }
  0xae   :  { %2236 = vmatprep.subr.bf16.mxu1 %v3280_v44  ;;  %v3397_v12 = vld [vmem:[#allocation44_spill] sm:$0xff] }
  0xb0   :  { %2077 = vmatpush1.bf16.msra.mxu0 %v2851_v24 }
  0xb1   :  { %2079 = vmatprep.subr.bf16.mxu0 %v2858_v23  ;;  %2238 = vmatpush3.bf16.msra.mxu1 %v2864_v32  ;;  %v1583_v23 = vld [vmem:[%s3131_s1] sm:$0x7] }
  0xb2   :  { %2239 = vmatprep.subr.bf16.mxu1 %v3280_v44 }
  0xb4   :  { %2081 = vmatpush1.bf16.msra.mxu0 %v2870_v6 }
  0xb5   :  { %2083 = vmatprep.subr.bf16.mxu0 %v2876_v61  ;;  %2241 = vmatpush3.bf16.msra.mxu1 %v2883_v8 }
  0xb6   :  { %2242 = vmatprep.subr.bf16.mxu1 %v3280_v44 }
  0xb8   :  { %2085 = vmatpush1.bf16.msra.mxu0 %v2889_v57 }
  0xb9   :  { %2087 = vmatprep.subr.bf16.mxu0 %v2895_v47  ;;  %2244 = vmatpush3.bf16.msra.mxu1 %v2901_v42 }
  0xba   :  { %2245 = vmatprep.subr.bf16.mxu1 %v3280_v44 }
  0xbc   :  { %2089 = vmatpush1.bf16.msra.mxu0 %v2907_v50 }
  0xbd   :  { %2091 = vmatprep.subr.bf16.mxu0 %v2913_v54  ;;  %2247 = vmatpush3.bf16.msra.mxu1 %v3393_v9 }
  0xbe   :  { %2248 = vmatprep.subr.bf16.mxu1 %v3280_v44 }
  0xc0   :  { %2093 = vmatpush1.bf16.msra.mxu0 %v3394_v15 }
  0xc1   :  { %2095 = vmatprep.subr.bf16.mxu0 %v3395_v29  ;;  %2250 = vmatpush3.bf16.msra.mxu1 %v3396_v55 }
  0xc2   :  { %2251 = vmatprep.subr.bf16.mxu1 %v3280_v44 }
  0xc4   :  { %2097 = vmatpush1.bf16.msra.mxu0 %v2944_v27 }
  0xc5   :  { %2099 = vmatprep.subr.bf16.mxu0 %v2950_v34  ;;  %2253 = vmatpush3.bf16.msra.mxu1 %v2956_v63 }
  0xc6   :  { %2254 = vmatprep.subr.bf16.mxu1 %v3280_v44 }
  0xc8   :  { %2101 = vmatpush1.bf16.msra.mxu0 %v2960_v48  ;;  %1905 = vmatmul.mubr.f32.vlgmr.msra.gmra.mrb[0].mxu1 %v3397_v12 }
  0xc9   :  { %2103 = vmatprep.subr.bf16.mxu0 %v3368_v56  ;;  %2256 = vmatpush3.bf16.msra.mxu1 %v3369_v60 }
  0xca   :  { %2257 = vmatprep.subr.bf16.mxu1 %v3280_v44  ;;  %1939 = vmatprep.mubr.msk.f32.mxu1 %vm2363_vm0, %v3302_v41 }
  0xcb   :  { %827 = vmatmul.mubr.f32.vlgmr.msra.gmra.mrb[0].mxu0 %v3397_v12 }
  0xcc   :  { %2105 = vmatpush1.bf16.msra.mxu0 %v3370_v3  ;;  %929 = vmatprep.mubr.f32.mxu0 %v3302_v41  ;;  %v1585_v41 = vlaneseq }
  0xcd   :  { %2107 = vmatprep.subr.bf16.mxu0 %v3371_v5  ;;  %2259 = vmatpush3.bf16.msra.mxu1 %v3372_v30 }
  0xce   :  { %2260 = vmatprep.subr.bf16.mxu1 %v3280_v44  ;;  %v1586_v34 = vshrl.u32 %v1585_v41, 7 }
  0xd0   :  { %2109 = vmatpush1.bf16.msra.mxu0 %v3373_v33  ;;  %v1595_v24 = vsub.s32 2, %v1586_v34  ;;  %v1587_v32 = vsub.s32 0, %v1586_v34  ;;  %v1591_v61 = vsub.s32 1, %v1586_v34 }
  0xd1   :  { %2111 = vmatprep.subr.bf16.mxu0 %v3374_v13  ;;  %2262 = vmatpush3.bf16.msra.mxu1 %v3375_v35 }
  0xd2   :  { %2263 = vmatprep.subr.bf16.mxu1 %v3280_v44  ;;  %v1596_v6 = vrot.slane %v1583_v23, %v1595_v24  ;;  %v1588_v42 = vrot.slane %v1583_v23, %v1587_v32  ;;  %v1592_v63 = vrot.slane %v1583_v23, %v1591_v61 }
  0xd4   :  { %2113 = vmatpush1.bf16.msra.mxu0 %v3376_v45 }
  0xd5   :  { %2115 = vmatprep.subr.bf16.mxu0 %v3377_v58  ;;  %2265 = vmatpush3.bf16.msra.mxu1 %v3378_v28 }
  0xd6   :  { %2266 = vmatprep.subr.bf16.mxu1 %v3280_v44 }
  0xd8   :  { %2117 = vmatpush1.bf16.msra.mxu0 %v3379_v4 }
  0xd9   :  { %2119 = vmatprep.subr.bf16.mxu0 %v3380_v31  ;;  %2268 = vmatpush3.bf16.msra.mxu1 %v3381_v1 }
  0xda   :  { %2269 = vmatprep.subr.bf16.mxu1 %v3280_v44 }
  0xdc   :  { %2121 = vmatpush1.bf16.msra.mxu0 %v3382_v26 }
  0xdd   :  { %2123 = vmatprep.subr.bf16.mxu0 %v3383_v22  ;;  %2271 = vmatpush3.bf16.msra.mxu1 %v3384_v59 }
  0xde   :  { %2272 = vmatprep.subr.bf16.mxu1 %v3280_v44 }
  0xe0   :  { %2125 = vmatpush1.bf16.msra.mxu0 %v3385_v39 }
  0xe1   :  { %2127 = vmatprep.subr.bf16.mxu0 %v3386_v2  ;;  %2274 = vmatpush3.bf16.msra.mxu1 %v3387_v18 }
  0xe2   :  { %2275 = vmatprep.subr.bf16.mxu1 %v3280_v44  ;;  %v1579_v44 = vstv %s3130_s0  ;;  %s2365_s0 = smov [#allocation6]  }
  0xe3   :  { %s1621_s1 = sshll.u32 %s2365_s0, 4  ;;  %s1622_s1 = int_to_ptr.vmem [resolvable:$true] %s1621_s1 }
  0xe4   :  { %2129 = vmatpush1.bf16.msra.mxu0 %v3388_v40  ;;  %s2333_s7 = scalar_lea.vmem %s1622_s1, 384  ;;  %p2338_p9 = scmp.lt.s32.totalorder %s1622_s1, %s1622_s1 }
  0xe5   :  { %2131 = vmatprep.subr.bf16.mxu0 %v3389_v11  ;;  %2277 = vmatpush3.bf16.msra.mxu1 %v3390_v25  ;;  %p2334_p8 = scmp.ne.s32.totalorder %s1622_s1, %s2333_s7  ;;  %p2339_p10 = scmp.lt.s32.totalorder %s2333_s7, %s2333_s7 }
  0xe7   :  { %p2340_p11 = por %p2339_p10, %p2338_p9 }
  0xe8   :  { %2133 = vmatpush1.bf16.msra.mxu0 %v3391_v43  ;;  %1940 = vmatmul.mubr.f32.vlgmr.msra.gmra.mrb[0].mxu1 %v3397_v12 }
  0xe9   :  { %p2341_p12 = pnand %p2340_p11, %p2334_p8 }
  0xeb   :  { %931 = vmatmul.mubr.f32.vlgmr.msra.gmra.mrb[0].mxu0 %v3397_v12 }
 0x1bb   :  { %v1574_v8 = vpop.f32.mrb[0].mxu1 }
 0x1bc   :  { %v1582_v57 = vmul.f32 %v1579_v44, %v1574_v8  ;;  %v1941_v47 = vpop.f32.mrb[1].mxu1 }
 0x1be   :  { %v1602_v50 = vsub.f32 %v1582_v57, %v1596_v6  ;;  %v932_v54 = vpop.f32.mrb[0].mxu0 }
 0x1bf   :  { %v1580_v48 = vmul.f32 %v1579_v44, %v932_v54  ;;  %v934_v27 = vpop.f32.mrb[1].mxu0 }
 0x1c0   :  { %2305 = vtanh.f32 %v1602_v50  ;;  %v1581_v20 = vmul.f32 %v1579_v44, %v934_v27 }
 0x1c1   :  { %v1600_v46 = vsub.f32 %v1580_v48, %v1588_v42 }
 0x1c2   :  { %v1601_v19 = vsub.f32 %v1581_v20, %v1592_v63 }
 0x1c3   :  { %2307 = vtanh.f32 %v1600_v46 }
 0x1c4   :  { %2309 = vtanh.f32 %v1601_v19 }
 0x1ca   :  { %v2306_v49 = vpop.eup %2305 }
 0x1cb   :  { %v1608_v10 = vmul.f32 0.5, %v2306_v49 }
 0x1cd   :  { %v2308_v14 = vpop.eup %2307  ;;  %v1611_v16 = vadd.f32 0.5, %v1608_v10 }
 0x1ce   :  { %v2310_v21 = vpop.eup %2309  ;;  %v1606_v37 = vmul.f32 0.5, %v2308_v14 }
 0x1cf   :  { %1614 = vst [vmem:[#allocation6 + $0x10] sm:$0xff] %v1611_v16  ;;  %v1607_v38 = vmul.f32 0.5, %v2310_v21 }
 0x1d0   :  { %v1609_v36 = vadd.f32 0.5, %v1606_v37 }
 0x1d1   :  { %v1610_v62 = vadd.f32 0.5, %v1607_v38 }
 0x1d2   :  { %1612 = vst [vmem:[#allocation6] sm:$0xff] %v1609_v36 }
 0x1d3   :  { %1613 = vst [vmem:[#allocation6 + $0x8] sm:$0xff] %v1610_v62 }
 0x1d4   :  { %2344 = shalt.err (!%p2341_p12)
}
 0x1d5   :  { %s2345_s10 = scalar_lea.hbm %s3134_s4, 384 }
 0x1d6   :  { %p2346_p13 = scmp.ne.s32.totalorder %s3134_s4, %s2345_s10  ;;  %p2349_p0 = scmp.lt.u32.totalorder %s2345_s10, %s3134_s4 }
 0x1d8   :  { %p2351_p1 = pnand %p2349_p0, %p2346_p13 }
 0x1da   :  { %2354 = shalt.err (!%p2351_p1)
}
 0x1db   :  { %1624 = dma.vmem_to_hbm [thread:$0]  %s1622_s1, 384, %s3134_s4, [#allocation5]  }
 0x1dc   :  { %2357 = dma.done.wait [#allocation5], 384  }
 0x1dd   :  { %2358 = vsyncadd [#allocation5], 4294966912 }
 0x1de   :  { %1628 = vsyncpa [#allocation4], 1 }
 0x1df   :  { %1629 = vsyncpa [#allocation5], 1 }

</bundles_post_ra>
